<compile_context>
chip_gen: v6e
topology: v6e:2x2x1
jax: 0.10.0
libtpu: 0.0.40
codegen_flags: <defaults>
</compile_context>

<pallas_src>
import jax
import jax.numpy as jnp
from jax.experimental import pallas as pl
from jax.experimental.pallas import tpu as pltpu

_LANE = 128
_SUBLANE = 8
# 4096 sublane rows * 128 lanes * 4 B = 2 MiB per input block
# -> 2 inputs * 2 pipeline buffers * 2 MiB = 8 MiB peak input footprint.
_MAX_SUBLANE_ROWS = 4096


def _l2_loss_kernel(a_ref, b_ref, o_ref, acc_ref):
    """Accumulate per-lane sums of squared differences over feature chunks.

    Grid: (batch, feature_chunks); axis 1 is the reduction ("arbitrary") axis.
    a_ref/b_ref blocks: (1, r_chunk, 128).  acc_ref: (1, 1, 128) f32, resident
    across the reduction axis.
    """
    k = pl.program_id(1)

    @pl.when(k == 0)
    def _init():
        acc_ref[...] = jnp.zeros_like(acc_ref)

    d = a_ref[...].astype(jnp.float32) - b_ref[...].astype(jnp.float32)
    # Sum over the sublane (rows) axis only; keep the 128 lanes separate so the
    # hot loop never does a cross-lane reduce and the output store stays
    # lane-dense.
    acc_ref[...] += jnp.sum(d * d, axis=1, keepdims=True)

    @pl.when(k == pl.num_programs(1) - 1)
    def _finalize():
        o_ref[...] = acc_ref[...].astype(o_ref.dtype)


def l2_loss(in_1: jax.Array, in_2: jax.Array) -> jax.Array:
    """Equivalent to F.mse_loss(in_1, in_2, reduction='none').flatten(1).mean(1)."""
    assert in_1.shape == in_2.shape, "inputs must have identical shapes"
    B = in_1.shape[0]
    F = 1
    for s in in_1.shape[1:]:
        F *= s

    # --- tiling: features -> (rows of 128 lanes), rows chunked on sublanes ---
    r_total = -(-F // _LANE)                              # rows of 128 needed
    r_total = -(-r_total // _SUBLANE) * _SUBLANE          # round up to 8 sublanes
    n_chunks = -(-r_total // _MAX_SUBLANE_ROWS)           # how many reduction steps
    r_chunk = -(-r_total // n_chunks)                     # balance the chunks
    r_chunk = -(-r_chunk // _SUBLANE) * _SUBLANE          # keep multiple of 8
    padded_rows = n_chunks * r_chunk
    f_pad = padded_rows * _LANE

    a = in_1.reshape(B, F)
    b = in_2.reshape(B, F)
    if f_pad != F:
        # Zero-pad both inputs identically: padded positions give diff == 0,
        # so they contribute nothing to the sum of squares (exact result).
        pad = ((0, 0), (0, f_pad - F))
        a = jnp.pad(a, pad)
        b = jnp.pad(b, pad)
    a = a.reshape(B, padded_rows, _LANE)
    b = b.reshape(B, padded_rows, _LANE)

    partial = pl.pallas_call(
        _l2_loss_kernel,
        out_shape=jax.ShapeDtypeStruct((B, 1, _LANE), jnp.float32),
        grid_spec=pltpu.PrefetchScalarGridSpec(
            num_scalar_prefetch=0,
            grid=(B, n_chunks),
            in_specs=[
                pl.BlockSpec((1, r_chunk, _LANE), lambda i, k: (i, k, 0)),
                pl.BlockSpec((1, r_chunk, _LANE), lambda i, k: (i, k, 0)),
            ],
            out_specs=pl.BlockSpec((1, 1, _LANE), lambda i, k: (i, 0, 0)),
            scratch_shapes=[pltpu.VMEM((1, 1, _LANE), jnp.float32)],
        ),
        compiler_params=pltpu.CompilerParams(
            dimension_semantics=("parallel", "arbitrary"),
            vmem_limit_bytes=32 * 1024 * 1024,
        ),
    )(a, b)

    # Final cross-lane reduce of the tiny (B, 128) partials + mean scale.
    out = (jnp.sum(partial[:, 0, :], axis=-1) * (1.0 / F)).astype(in_1.dtype)
    return out


if __name__ == "__main__":
    key = jax.random.PRNGKey(0)
    k1, k2 = jax.random.split(key)

    # Small NCHW inputs, consistent with the module's forward.
    x = jax.random.normal(k1, (2, 4, 16, 16), dtype=jnp.float32)
    y = jax.random.normal(k2, (2, 4, 16, 16), dtype=jnp.float32)

    out = l2_loss(x, y)
    jax.block_until_ready(out)

    # Reference check (plain JAX) mirroring the PyTorch semantics.
    ref = jnp.mean((x - y) ** 2, axis=(1, 2, 3))
    assert out.shape == (2,)
    assert jnp.allclose(out, ref, rtol=1e-5, atol=1e-6), (out, ref)

    # Extra check: non-divisible feature count exercises the zero-pad path.
    x2 = jax.random.normal(k1, (3, 5, 7, 11), dtype=jnp.float32)
    y2 = jax.random.normal(k2, (3, 5, 7, 11), dtype=jnp.float32)
    out2 = l2_loss(x2, y2)
    jax.block_until_ready(out2)
    ref2 = jnp.mean((x2 - y2) ** 2, axis=(1, 2, 3))
    assert jnp.allclose(out2, ref2, rtol=1e-5, atol=1e-6), (out2, ref2)

    print("KERNEL_OK")
</pallas_src>

<mosaic_0001>
module attributes {stable_mosaic.version = 11 : i64} {
  func.func @_l2_loss_kernel(%arg0: i32, %arg1: i32, %arg2: memref<1x8x128xf32, #tpu.memory_space<vmem>>, %arg3: memref<1x8x128xf32, #tpu.memory_space<vmem>>, %arg4: memref<1x1x128xf32, #tpu.memory_space<vmem>>, %arg5: memref<1x1x128xf32, #tpu.memory_space<vmem>>) attributes {dimension_semantics = [#tpu.dimension_semantics<parallel>, #tpu.dimension_semantics<arbitrary>], iteration_bounds = array<i64: 2, 1>, scalar_prefetch = 0 : i64, scratch_operands = 1 : i64, tpu.core_type = #tpu.core_type<tc>, window_params = [{transform_indices = @transform_0, window_bounds = array<i64: 1, 8, 128>}, {transform_indices = @transform_1, window_bounds = array<i64: 1, 8, 128>}, {transform_indices = @transform_2, window_bounds = array<i64: 1, 1, 128>}]} {
    %c0_i32 = arith.constant 0 : i32
    %0 = arith.cmpi eq, %arg1, %c0_i32 : i32
    %1 = arith.extui %0 : i1 to i32
    %c0_i32_0 = arith.constant 0 : i32
    %2 = arith.cmpi ne, %1, %c0_i32_0 : i32
    scf.if %2 {
      %cst_14 = arith.constant 0.000000e+00 : f32
      %15 = vector.broadcast %cst_14 : f32 to vector<1x1x128xf32>
      %c0_15 = arith.constant 0 : index
      %c0_16 = arith.constant 0 : index
      %c0_17 = arith.constant 0 : index
      %16 = vector.load %arg5[%c0_15, %c0_16, %c0_17] : memref<1x1x128xf32, #tpu.memory_space<vmem>>, vector<1x1x128xf32>
      tpu.vector_store %arg5[%c0_15, %c0_16, %c0_17], %15 {strides = array<i32>} : memref<1x1x128xf32, #tpu.memory_space<vmem>>, vector<1x1x128xf32>,
    } else {
    }
    %c0 = arith.constant 0 : index
    %c0_1 = arith.constant 0 : index
    %c0_2 = arith.constant 0 : index
    %3 = vector.load %arg2[%c0, %c0_1, %c0_2] : memref<1x8x128xf32, #tpu.memory_space<vmem>>, vector<1x8x128xf32>
    %c0_3 = arith.constant 0 : index
    %c0_4 = arith.constant 0 : index
    %c0_5 = arith.constant 0 : index
    %4 = vector.load %arg3[%c0_3, %c0_4, %c0_5] : memref<1x8x128xf32, #tpu.memory_space<vmem>>, vector<1x8x128xf32>
    %5 = arith.subf %3, %4 : vector<1x8x128xf32>
    %c0_6 = arith.constant 0 : index
    %c0_7 = arith.constant 0 : index
    %c0_8 = arith.constant 0 : index
    %6 = vector.load %arg5[%c0_6, %c0_7, %c0_8] : memref<1x1x128xf32, #tpu.memory_space<vmem>>, vector<1x1x128xf32>
    %7 = arith.mulf %5, %5 : vector<1x8x128xf32>
    %cst = arith.constant dense<0.000000e+00> : vector<1x128xf32>
    %8 = vector.multi_reduction <add>, %7, %cst [1] : vector<1x8x128xf32> to vector<1x128xf32>
    %9 = vector.shape_cast %8 : vector<1x128xf32> to vector<1x1x128xf32>
    %10 = arith.addf %6, %9 : vector<1x1x128xf32>
    %c0_9 = arith.constant 0 : index
    %c0_10 = arith.constant 0 : index
    %c0_11 = arith.constant 0 : index
    %11 = vector.load %arg5[%c0_9, %c0_10, %c0_11] : memref<1x1x128xf32, #tpu.memory_space<vmem>>, vector<1x1x128xf32>
    tpu.vector_store %arg5[%c0_9, %c0_10, %c0_11], %10 {strides = array<i32>} : memref<1x1x128xf32, #tpu.memory_space<vmem>>, vector<1x1x128xf32>,
    %c0_i32_12 = arith.constant 0 : i32
    %12 = arith.cmpi eq, %arg1, %c0_i32_12 : i32
    %13 = arith.extui %12 : i1 to i32
    %c0_i32_13 = arith.constant 0 : i32
    %14 = arith.cmpi ne, %13, %c0_i32_13 : i32
    scf.if %14 {
      %c0_14 = arith.constant 0 : index
      %c0_15 = arith.constant 0 : index
      %c0_16 = arith.constant 0 : index
      %15 = vector.load %arg5[%c0_14, %c0_15, %c0_16] : memref<1x1x128xf32, #tpu.memory_space<vmem>>, vector<1x1x128xf32>
      %c0_17 = arith.constant 0 : index
      %c0_18 = arith.constant 0 : index
      %c0_19 = arith.constant 0 : index
      %16 = vector.load %arg4[%c0_17, %c0_18, %c0_19] : memref<1x1x128xf32, #tpu.memory_space<vmem>>, vector<1x1x128xf32>
      tpu.vector_store %arg4[%c0_17, %c0_18, %c0_19], %15 {strides = array<i32>} : memref<1x1x128xf32, #tpu.memory_space<vmem>>, vector<1x1x128xf32>,
    } else {
    }
    return
  }
  func.func @transform_0(%arg0: i32, %arg1: i32) -> (i32, i32, i32) {
    %c0_i32 = arith.constant 0 : i32
    %c0_i32_0 = arith.constant 0 : i32
    return %arg0, %arg1, %c0_i32 : i32, i32, i32
  }
  func.func @transform_1(%arg0: i32, %arg1: i32) -> (i32, i32, i32) {
    %c0_i32 = arith.constant 0 : i32
    %c0_i32_0 = arith.constant 0 : i32
    return %arg0, %arg1, %c0_i32 : i32, i32, i32
  }
  func.func @transform_2(%arg0: i32, %arg1: i32) -> (i32, i32, i32) {
    %c0_i32 = arith.constant 0 : i32
    %c0_i32_0 = arith.constant 0 : i32
    %c0_i32_1 = arith.constant 0 : i32
    return %arg0, %c0_i32, %c0_i32_0 : i32, i32, i32
  }
}

</mosaic_0001>

<bundles_post_ra>
// kernel: tpu_custom_call.1
= control target key start
LH: loop header
LB: loop body
LE: loop exit
PB: predicated region body
PF: predicated region fallthrough
CT: control target
= control target key end

     0   :  { %7 = vsyncpa [#allocation4], 0  ;;  %s759_s0 = inlined_call_operand.hbm [shape: f32[2,8,128], index: 0, kind: input, shape index: {}]   ;;  %s760_s1 = inlined_call_operand.hbm [shape: f32[2,8,128], index: 1, kind: input, shape index: {}]   ;;  %s761_s2 = inlined_call_operand.hbm [shape: f32[2,1,128], index: 2, kind: output, shape index: {}]  }
   0x1   :  { %9 = vsyncpa [#allocation4 + $0x1], 0 }
   0x2   :  { %10 = vsyncpa [#allocation7], 0 }
   0x3   :  { %12 = vsyncpa [#allocation7 + $0x1], 0 }
   0x4   :  { %13 = vsyncpa [#allocation5], 0 }
   0x5   :  { %15 = vsyncpa [#allocation5 + $0x1], 0  ;;  %s591_s9 = smov 0   ;;  %s593_s10 = smov 0  }
   0x6   :  { %s595_s11 = smov 0   ;;  %s597_s12 = smov 0  }
   0x7   :  { %s599_s13 = smov 0   ;;  %s601_s14 = smov 0  }
   0x8 LB: > { %s348_s15 = sadd.s32 4294967295, %s570_s14   ;;  %s349_s16 = sadd.s32 4294967294, %s570_s14   ;;  %s570_s14 = sphi %s601_s14, %s21_s14   ;;  %s566_s13 = sphi %s599_s13, %s773_s13   ;;  %s562_s12 = sphi %s597_s12, %s772_s12   ;;  %s558_s11 = sphi %s595_s11, %s771_s11   ;;  %s554_s10 = sphi %s593_s10, %s770_s10   ;;  %s550_s9 = sphi %s591_s9, %s769_s9  }
   0x9   : > { %s33_s17 = sadd.s32 1, %s566_s13  ;;  %s42_s18 = sadd.s32 1, %s558_s11 }
   0xa   : > { %p35_p0 = scmp.ge.s32.totalorder %s33_s17, 2  ;;  %p49_p1 = scmp.ne.s32.totalorder %s558_s11, %s554_s10 }
   0xb   : > { %p50_p2 = scmp.eq.s32.totalorder %s570_s14, 0  ;;  %p55_p3 = scmp.ne.s32.totalorder %s554_s10, %s550_s9 }
   0xc   : > { %s775_s17 = smov (%p35_p0, %s33_s17), 0  ;;  %p56_p5 = scmp.eq.s32.totalorder %s348_s15, 0 }
   0xd   : > { %p632_p4 = por %p50_p2, %p49_p1  ;;  %s37_s20 = ssub.s32 %s566_s13, %s775_s17 }
   0xe   : > { %p107_p6 = scmp.eq.s32.totalorder %s348_s15, 1  ;;  %p40_p7 = scmp.eq.s32.totalorder %s37_s20, 0 }
   0xf   : > { %p638_p8 = por %p56_p5, %p55_p3  ;;  %p113_p10 = scmp.eq.s32.totalorder %s349_s16, 1 }
  0x10   : > { %p642_p9 = por %p107_p6, %p49_p1  ;;  %p379_p13 = scmp.lt.s32.totalorder %s570_s14, 2 }
  0x11   : > { %s647_s23 = scalar_select %p40_p7, %s558_s11, %s42_s18  }
  0x12   : > { %p649_p11 = por %p113_p10, %p55_p3  ;;  %s656_s25 = sand.u32 1, %s558_s11  }
  0x13   : > { %s352_s26 = sshll.u32 %s656_s25, 3  ;;  %s353_s27 = sshll.u32 %s566_s13, 7 }
  0x14   : > { %s143_s30 = scalar_lea.hbm %s759_s0, %s353_s27  ;;  %s137_s3 = scalar_lea.vmem [#allocation3], %s352_s26 }
  0x15   : > { %s145_s4 = sshll.u32 %s137_s3, 4  ;;  %p665_p0 = pnand %p379_p13, %p632_p4  ;;  %s146_s4 = int_to_ptr.vmem [resolvable:$true] %s145_s4 }
  0x16   : > { %p356_p1 = scmp.ge.s32.totalorder %s570_s14, 1  ;;  %p169_p2 = scmp.lt.s32.totalorder %s570_s14, 3 }
  0x17   : > { %s134_s6 = scalar_lea.sflag [#allocation4], %s656_s25  ;;  %p432_p3 = pneg %p665_p0 }
  0x18   : > { %s443_s7 = scalar_lea.vmem %s146_s4, 128  ;;  %s572_s8 = smov [#allocation3]  }
  0x19   : > { %p444_p5 = scmp.ne.s32.totalorder %s146_s4, %s443_s7  ;;  %s448_s15 = sshll.u32 %s572_s8, 4  ;;  %s449_s15 = int_to_ptr.vmem [resolvable:$false] %s448_s15 }
  0x1a   : > { %s450_s16 = scalar_lea.vmem %s449_s15, 256  ;;  %p451_p4 = scmp.lt.s32.totalorder %s146_s4, %s449_s15 }
  0x1b   : > { %p446_p6 = pnand %p444_p5, %p432_p3  ;;  %p452_p10 = scmp.lt.s32.totalorder %s450_s16, %s443_s7 }
  0x1d   : > { %p447_p7 = pneg %p446_p6  ;;  %p453_p13 = por %p452_p10, %p451_p4 }
  0x1f   : > { %p454_p12 = pnand %p453_p13, %p447_p7 }
  0x21   : > { %457 = shalt.err (!%p454_p12)
}
  0x22   : > { %371 = dma.hbm_to_vmem [thread:$0]  (!%p665_p0), %s143_s30, 128, %s146_s4, %s134_s6  }
  0x23   : > { %p683_p5 = pnand %p356_p1, %p169_p2  ;;  %s162_s28 = scalar_lea.hbm %s760_s1, %s353_s27 }
  0x24   : > { %s156_s29 = scalar_lea.vmem [#allocation6], %s352_s26  ;;  %s153_s7 = scalar_lea.sflag [#allocation7], %s656_s25 }
  0x25   : > { %s164_s3 = sshll.u32 %s156_s29, 4  ;;  %s573_s30 = smov [#allocation6]   ;;  %s165_s3 = int_to_ptr.vmem [resolvable:$true] %s164_s3 }
  0x26   : > { %s471_s8 = scalar_lea.vmem %s165_s3, 128  ;;  %s476_s4 = sshll.u32 %s573_s30, 4  ;;  %s477_s4 = int_to_ptr.vmem [resolvable:$false] %s476_s4 }
  0x27   : > { %p472_p12 = scmp.ne.s32.totalorder %s165_s3, %s471_s8  ;;  %s478_s6 = scalar_lea.vmem %s477_s4, 256 }
  0x28   : > { %p479_p1 = scmp.lt.s32.totalorder %s165_s3, %s477_s4  ;;  %p480_p2 = scmp.lt.s32.totalorder %s478_s6, %s471_s8 }
  0x29   : > { %p474_p6 = pnand %p472_p12, %p432_p3 }
  0x2a   : > { %p481_p4 = por %p480_p2, %p479_p1 }
  0x2b   : > { %p475_p7 = pneg %p474_p6 }
  0x2d   : > { %p482_p10 = pnand %p481_p4, %p475_p7 }
  0x2f   : > { %485 = shalt.err (!%p482_p10)
}
  0x30   : > { %374 = dma.hbm_to_vmem [thread:$0]  (!%p665_p0), %s162_s28, 128, %s165_s3, %s153_s7  }
  0x31   : > { %173 = sbr.rel (%p683_p5) target bundleno = 97 (0x61), region = 28  ;;  %s699_s25 = sand.u32 (!%p683_p5), 1, %s554_s10  }
  0x32   : > { %s357_s26 = sshll.u32 (!%p683_p5), %s699_s25, 3  ;;  %s176_s27 = scalar_lea.sflag (!%p683_p5), [#allocation4], %s699_s25 }
  0x33   : > { %s179_s15 = scalar_lea.vmem (!%p683_p5), [#allocation3], %s357_s26 }
  0x36   : > { %537 = dma.done.wait (%p638_p8), %s176_s27, 128  }
  0x37   : > { %539 = vsyncadd (%p638_p8), %s176_s27, 4294967168  ;;  %s185_s5 = scalar_lea.sflag [#allocation7], %s699_s25  ;;  %s188_s16 = scalar_lea.vmem [#allocation6], %s357_s26 }
  0x38   : > { %541 = dma.done.wait (%p638_p8), %s185_s5, 128  }
  0x39   : > { %543 = vsyncadd (%p638_p8), %s185_s5, 4294967168  ;;  %v574_v0 = vmov 0.0   ;;  %v218_v1 = vld [vmem:[%s179_s15] sm:$0xff]  ;;  %v219_v2 = vld [vmem:[%s188_s16] sm:$0xff]  ;;  %s212_s21 = scalar_lea.vmem [#allocation8], %s699_s25  ;;  %s359_s19 = sshll.u32 %s562_s12, 4 }
  0x3a   : > { %217 = vst [vmem:[#allocation2] sm:$0x1] %v574_v0  ;;  %v220_v3 = vsub.f32 %v218_v1, %v219_v2  ;;  %s249_s18 = sshll.u32 %s212_s21, 4  ;;  %s247_s29 = scalar_lea.hbm %s761_s2, %s359_s19  ;;  %s714_s18 = int_to_ptr.vmem [resolvable:$true] %s249_s18 }
  0x3b   : > { %s237_s3 = scalar_lea.sflag [#allocation5], %s699_s25  ;;  %s486_s7 = scalar_lea.vmem %s714_s18, 16 }
  0x3c   : > { %v222_v4 = vmul.f32 %v220_v3, %v220_v3  ;;  %p487_p8 = scmp.ne.s32.totalorder %s714_s18, %s486_s7  ;;  %s575_s8 = smov [#allocation8]  }
  0x3d   : > { %s490_s30 = sshll.u32 %s575_s8, 4  ;;  %s491_s30 = int_to_ptr.vmem [resolvable:$false] %s490_s30 }
  0x3e   : > { %v223_v5 = vrot.slane %v222_v4, 4  ;;  %p488_p0 = pnand %p487_p8, %p642_p9  ;;  %s492_s12 = scalar_lea.vmem %s491_s30, 32 }
  0x3f   : > { %p493_p13 = scmp.lt.s32.totalorder %s714_s18, %s491_s30  ;;  %p494_p5 = scmp.lt.s32.totalorder %s492_s12, %s486_s7 }
  0x40   : > { %v224_v6 = vadd.f32 %v223_v5, %v222_v4  ;;  %p489_p3 = pneg %p488_p0 }
  0x41   : > { %v221_v10 = vld [vmem:[#allocation2] sm:$0x1]  ;;  %p495_p12 = por %p494_p5, %p493_p13 }
  0x42   : > { %v225_v7 = vrot.slane %v224_v6, 2 }
  0x43   : > { %p496_p6 = pnand %p495_p12, %p489_p3 }
  0x44   : > { %v226_v8 = vadd.f32 %v225_v7, %v224_v6 }
  0x46   : > { %v227_v9 = vrot.slane %v226_v8, 1 }
  0x48   : > { %v228_v11 = vadd.f32 %v227_v9, %v226_v8 }
  0x4a   : > { %v229_v12 = vadd.f32 %v228_v11, %v221_v10 }
  0x4c   : > { %230 = vst [vmem:[#allocation2] sm:$0x1] %v229_v12 }
  0x53   : > { %v234_v13 = vld [vmem:[#allocation2] sm:$0x1] }
  0x54   : > { %235 = vst [vmem:[%s212_s21] sm:$0x1] %v234_v13 }
  0x55   : > { %499 = shalt.err (!%p496_p6)
}
  0x56   : > { %s500_s4 = scalar_lea.hbm %s247_s29, 16  ;;  %s504_s26 = scalar_lea.hbm %s761_s2, 32 }
  0x57   : > { %p501_p7 = scmp.ne.s32.totalorder %s247_s29, %s500_s4  ;;  %p505_p4 = scmp.lt.s32.totalorder %s247_s29, %s761_s2 }
  0x58   : > { %p506_p10 = scmp.lt.s32.totalorder %s504_s26, %s500_s4 }
  0x59   : > { %p502_p1 = pnand %p501_p7, %p642_p9 }
  0x5a   : > { %p507_p8 = por %p506_p10, %p505_p4 }
  0x5b   : > { %p503_p2 = pneg %p502_p1 }
  0x5d   : > { %p508_p0 = pnand %p507_p8, %p503_p2 }
  0x5f   : > { %511 = shalt.err (!%p508_p0)
}
  0x60   : > { %366 = dma.vmem_to_hbm [thread:$0]  (%p642_p9), %s714_s18, 16, %s247_s29, %s237_s3  }
  0x61 PF: > { %s261_s5 = sand.u32 1, %s550_s9   ;;  %p768_p3 = scmp.ge.s32.totalorder %s570_s14, 2 }
  0x62   : > { %s262_s16 = scalar_lea.sflag [#allocation5], %s261_s5 }
  0x63   : > { %p376_p13 = pnand %p768_p3, %p649_p11 }
  0x65   : > { %p377_p5 = pneg %p376_p13 }
  0x67   : > { %545 = dma.done.wait (%p377_p5), %s262_s16, 16  }
  0x68   : > { %547 = vsyncadd (%p377_p5), %s262_s16, 4294967280  ;;  %s21_s14 = sadd.s32 1, %s570_s14   ;;  %s769_s9 = smov %s554_s10 }
  0x69   : > { %p18_p12 = scmp.ge.s32.totalorder %s21_s14, 4   ;;  %s770_s10 = smov %s558_s11 }
  0x6a   : > { %s771_s11 = smov %s647_s23  ;;  %s772_s12 = smov %s566_s13 }
  0x6b   : > { %s773_s13 = smov %s775_s17  ;;  %20 = sbr.rel (!%p18_p12) target bundleno = 8 (0x8), region = 94 }
  0x70   :  { %266 = vsyncpa [#allocation4], 1 }
  0x71   :  { %268 = vsyncpa [#allocation4 + $0x1], 1 }
  0x72   :  { %269 = vsyncpa [#allocation7], 1 }
  0x73   :  { %271 = vsyncpa [#allocation7 + $0x1], 1 }
  0x74   :  { %272 = vsyncpa [#allocation5], 1 }
  0x75   :  { %274 = vsyncpa [#allocation5 + $0x1], 1 }

</bundles_post_ra>
